<compile_context>
chip_gen: v7x
topology: tpu7x:2x2x1
jax: 0.10.0
libtpu: 0.0.40
codegen_flags: <defaults>
</compile_context>

<pallas_src>
import jax
import jax.numpy as jnp
from jax.experimental import pallas as pl
from jax.experimental.pallas import tpu as pltpu

BN_EPS = 1e-5


def _round_up(x, m):
    return ((x + m - 1) // m) * m


def similarity_kernel(x_ref, w1_ref, b1_ref, w2_ref, b2_ref, w3_ref, b3_ref, o_ref):
    # In-kernel f32 -> bf16 cast (no separate wrapper pass over x in HBM).
    x = x_ref[...].astype(jnp.bfloat16)                              # (TM, D)

    # ---- Linear(input_dim -> 128) + ReLU (bf16 operands, f32 MXU accumulate) ----
    h = jnp.dot(x, w1_ref[...], preferred_element_type=jnp.float32) + b1_ref[...]
    h = jnp.maximum(h, 0.0)

    # ---- BatchNorm1d(128) folded into w2/b2 (eval); Dropout(0.3) == identity ----
    # ---- Linear(128 -> 64) + ReLU ----
    h = jnp.dot(h.astype(jnp.bfloat16), w2_ref[...],
                preferred_element_type=jnp.float32) + b2_ref[...]
    h = jnp.maximum(h, 0.0)

    # ---- BatchNorm1d(64) folded into w3/b3 (eval); Dropout(0.3) == identity ----
    # ---- Linear(64 -> 1) + Sigmoid ----
    # A (TM,64)x(64,1) matmul wastes the MXU and the (1,64)x(TM,64)^T form risks
    # a per-tile XLU transpose, so compute it as VPU multiply + cross-lane sum.
    z = jnp.sum(h * w3_ref[...], axis=-1, keepdims=True) + b3_ref[0, 0]  # (TM, 1)
    o_ref[...] = jax.nn.sigmoid(z)


def fold_and_cast_params(params, eps=BN_EPS, matmul_dtype=jnp.bfloat16):
    """Fold eval-mode BatchNorm into the following Linear; cast matmul weights."""
    s1 = params["g1"] * jax.lax.rsqrt(params["v1"] + eps)           # (1, 128)
    t1 = params["be1"] - params["m1"] * s1                          # (1, 128)
    s2 = params["g2"] * jax.lax.rsqrt(params["v2"] + eps)           # (1, 64)
    t2 = params["be2"] - params["m2"] * s2                          # (1, 64)

    w2f = params["w2"] * s1.T                                       # (128, 64) row-scaled
    b2f = params["b2"] + t1 @ params["w2"]                          # (1, 64)
    w3f = (params["w3"] * s2.T).T                                   # (1, 64) row vector
    b3f = params["b3"] + t2 @ params["w3"]                          # (1, 1)

    return dict(
        w1=params["w1"].astype(matmul_dtype),
        b1=params["b1"].astype(jnp.float32),
        w2=w2f.astype(matmul_dtype),
        b2=b2f.astype(jnp.float32),
        w3=w3f.astype(jnp.float32),   # multiplied against f32 activations; keep f32
        b3=b3f.astype(jnp.float32),
    )


def _choose_tile(batch, input_dim, itemsize, *, target_block_bytes=1 << 20, max_tile=8192):
    """~1 MiB x-block per grid step, 128-row aligned, >=2 steps for big batches."""
    tm = _round_up(max(1, target_block_bytes // (itemsize * input_dim)), 128)
    tm = min(tm, max_tile, _round_up(batch, 128))
    tm = max(tm, 128)
    # v7x has 2 TensorCores: keep >= 2 grid steps for reasonably sized batches
    # so dimension_semantics=("parallel",) has something to shard.  For v5e/v6e
    # (1 TC) the extra step costs ~0.35 us — negligible.
    if pl.cdiv(batch, tm) < 2 and batch > 256:
        tm = _round_up(pl.cdiv(batch, 2), 128)
    return tm, pl.cdiv(batch, tm)


def similarity_nn(x, folded):
    """x: (B, input_dim) float32 -> (B, 1) float32 (eval-mode forward)."""
    B, D = x.shape
    itemsize = jnp.dtype(x.dtype).itemsize
    tm, num_tiles = _choose_tile(B, D, itemsize)

    param_bytes = (2 * D * 128 + 4 * 128 + 2 * 128 * 64 + 4 * 64 + 4 * 64 + 4)
    cost = pl.CostEstimate(
        flops=int(2 * B * (D * 128 + 128 * 64 + 64)),
        transcendentals=int(B),                         # sigmoid exp per row
        bytes_accessed=int(B * D * itemsize + B * 4 + param_bytes),
    )

    out = pl.pallas_call(
        similarity_kernel,
        out_shape=jax.ShapeDtypeStruct((B, 1), jnp.float32),
        grid=(num_tiles,),
        in_specs=[
            pl.BlockSpec((tm, D), lambda i: (i, 0)),         # x: tiled over batch
            pl.BlockSpec((D, 128), lambda i: (0, 0)),        # w1 (VMEM-resident)
            pl.BlockSpec((1, 128), lambda i: (0, 0)),        # b1
            pl.BlockSpec((128, 64), lambda i: (0, 0)),       # w2 (BN1 folded in)
            pl.BlockSpec((1, 64), lambda i: (0, 0)),         # b2 (BN1 folded in)
            pl.BlockSpec((1, 64), lambda i: (0, 0)),         # w3 row (BN2 folded in)
            pl.BlockSpec(memory_space=pltpu.MemorySpace.SMEM),  # b3 scalar (1, 1)
        ],
        out_specs=pl.BlockSpec((tm, 1), lambda i: (i, 0)),
        compiler_params=pltpu.CompilerParams(
            dimension_semantics=("parallel",),               # v7x: use both TCs
            vmem_limit_bytes=32 * 1024 * 1024,               # v5e default is ~16 MiB
        ),
        cost_estimate=cost,
    )(x, folded["w1"], folded["b1"], folded["w2"], folded["b2"],
      folded["w3"], folded["b3"])

    # Rows past B (from a partial last block, if any) were never valid; drop them.
    return out[:B]


def reference_forward(x, params, eps=BN_EPS):
    """Pure-JAX f32 reference matching the PyTorch module in eval mode."""
    h = jnp.maximum(x @ params["w1"] + params["b1"], 0.0)
    h = (h - params["m1"]) * jax.lax.rsqrt(params["v1"] + eps) * params["g1"] + params["be1"]
    h = jnp.maximum(h @ params["w2"] + params["b2"], 0.0)
    h = (h - params["m2"]) * jax.lax.rsqrt(params["v2"] + eps) * params["g2"] + params["be2"]
    z = h @ params["w3"] + params["b3"]
    return jax.nn.sigmoid(z)


def init_params(key, input_dim):
    """Deterministic synthetic parameters matching the PyTorch module's shapes."""
    ks = jax.random.split(key, 18)

    def linear_init(kw, kb, fan_in, fan_out):
        bound = 1.0 / (fan_in ** 0.5)
        w = jax.random.uniform(kw, (fan_in, fan_out), jnp.float32, -bound, bound)
        b = jax.random.uniform(kb, (1, fan_out), jnp.float32, -bound, bound)
        return w, b

    def bn_init(kg, kb, km, kv, feat):
        gamma = 1.0 + 0.1 * jax.random.normal(kg, (1, feat), jnp.float32)
        beta = 0.1 * jax.random.normal(kb, (1, feat), jnp.float32)
        mean = 0.1 * jax.random.normal(km, (1, feat), jnp.float32)
        var = jax.random.uniform(kv, (1, feat), jnp.float32, 0.5, 1.5)
        return gamma, beta, mean, var

    w1, b1 = linear_init(ks[0], ks[1], input_dim, 128)
    g1, be1, m1, v1 = bn_init(ks[2], ks[3], ks[4], ks[5], 128)
    w2, b2 = linear_init(ks[6], ks[7], 128, 64)
    g2, be2, m2, v2 = bn_init(ks[8], ks[9], ks[10], ks[11], 64)
    w3, b3 = linear_init(ks[12], ks[13], 64, 1)

    return dict(
        w1=w1, b1=b1, g1=g1, be1=be1, m1=m1, v1=v1,
        w2=w2, b2=b2, g2=g2, be2=be2, m2=m2, v2=v2,
        w3=w3, b3=b3,
    )


if __name__ == "__main__":
    key = jax.random.PRNGKey(0)
    k_x, k_p = jax.random.split(key)

    # 512 rows -> two exact 256-row tiles (exercises the multi-step "parallel" grid).
    B, INPUT_DIM = 512, 32
    x = jax.random.normal(k_x, (B, INPUT_DIM), jnp.float32)
    params = init_params(k_p, INPUT_DIM)

    folded = fold_and_cast_params(params)
    out = similarity_nn(x, folded)
    out = jax.block_until_ready(out)

    assert out.shape == (B, 1), out.shape
    assert out.dtype == jnp.float32
    assert bool(jnp.all((out >= 0.0) & (out <= 1.0)))  # sigmoid range sanity check

    # bf16 matmuls with f32 accumulation: loose tolerance vs the f32 reference.
    ref = reference_forward(x, params)
    assert bool(jnp.all(jnp.abs(out - ref) < 5e-2)), float(jnp.max(jnp.abs(out - ref)))

    print("KERNEL_OK")
</pallas_src>

<mosaic_0001>
module attributes {stable_mosaic.version = 11 : i64} {
  func.func @similarity_kernel(%arg0: i32, %arg1: memref<256x32xf32, #tpu.memory_space<vmem>>, %arg2: memref<32x128xbf16, #tpu.memory_space<vmem>>, %arg3: memref<1x128xf32, #tpu.memory_space<vmem>>, %arg4: memref<128x64xbf16, #tpu.memory_space<vmem>>, %arg5: memref<1x64xf32, #tpu.memory_space<vmem>>, %arg6: memref<1x64xf32, #tpu.memory_space<vmem>>, %arg7: memref<1x1xf32, #tpu.memory_space<smem>>, %arg8: memref<256x1xf32, #tpu.memory_space<vmem>>) attributes {dimension_semantics = [#tpu.dimension_semantics<parallel>], iteration_bounds = array<i64: 2>, scalar_prefetch = 0 : i64, scratch_operands = 0 : i64, tpu.core_type = #tpu.core_type<tc>, window_params = [{transform_indices = @transform_0, window_bounds = array<i64: 256, 32>}, {pipeline_mode = #tpu.pipeline_mode<synchronous>, transform_indices = @transform_1, window_bounds = array<i64: 32, 128>}, {pipeline_mode = #tpu.pipeline_mode<synchronous>, transform_indices = @transform_2, window_bounds = array<i64: 1, 128>}, {pipeline_mode = #tpu.pipeline_mode<synchronous>, transform_indices = @transform_3, window_bounds = array<i64: 128, 64>}, {pipeline_mode = #tpu.pipeline_mode<synchronous>, transform_indices = @transform_4, window_bounds = array<i64: 1, 64>}, {pipeline_mode = #tpu.pipeline_mode<synchronous>, transform_indices = @transform_5, window_bounds = array<i64: 1, 64>}, {transform_indices = @transform_6, window_bounds = array<i64: 1, 1>}, {transform_indices = @transform_7, window_bounds = array<i64: 256, 1>}]} {
    %c0 = arith.constant 0 : index
    %c0_0 = arith.constant 0 : index
    %0 = vector.load %arg1[%c0, %c0_0] : memref<256x32xf32, #tpu.memory_space<vmem>>, vector<256x32xf32>
    %1 = arith.truncf %0 : vector<256x32xf32> to vector<256x32xbf16>
    %c0_1 = arith.constant 0 : index
    %c0_2 = arith.constant 0 : index
    %2 = vector.load %arg2[%c0_1, %c0_2] : memref<32x128xbf16, #tpu.memory_space<vmem>>, vector<32x128xbf16>
    %cst = arith.constant dense<0.000000e+00> : vector<256x128xf32>
    %3 = tpu.matmul %1, %2, %cst {dimension_numbers = #tpu.dot_dimension_numbers<[1], [0], [0], [1], [0, 0, 1, 1], [], []>} : vector<256x32xbf16>, vector<32x128xbf16>, vector<256x128xf32> -> vector<256x128xf32>
    %c0_3 = arith.constant 0 : index
    %c0_4 = arith.constant 0 : index
    %4 = vector.load %arg3[%c0_3, %c0_4] : memref<1x128xf32, #tpu.memory_space<vmem>>, vector<1x128xf32>
    %5 = vector.broadcast %4 : vector<1x128xf32> to vector<256x128xf32>
    %6 = arith.addf %3, %5 : vector<256x128xf32>
    %cst_5 = arith.constant 0.000000e+00 : f32
    %7 = vector.broadcast %cst_5 : f32 to vector<256x128xf32>
    %8 = arith.maximumf %6, %7 : vector<256x128xf32>
    %9 = arith.truncf %8 : vector<256x128xf32> to vector<256x128xbf16>
    %c0_6 = arith.constant 0 : index
    %c0_7 = arith.constant 0 : index
    %10 = vector.load %arg4[%c0_6, %c0_7] : memref<128x64xbf16, #tpu.memory_space<vmem>>, vector<128x64xbf16>
    %cst_8 = arith.constant dense<0.000000e+00> : vector<256x64xf32>
    %11 = tpu.matmul %9, %10, %cst_8 {dimension_numbers = #tpu.dot_dimension_numbers<[1], [0], [0], [1], [0, 0, 1, 1], [], []>} : vector<256x128xbf16>, vector<128x64xbf16>, vector<256x64xf32> -> vector<256x64xf32>
    %c0_9 = arith.constant 0 : index
    %c0_10 = arith.constant 0 : index
    %12 = vector.load %arg5[%c0_9, %c0_10] : memref<1x64xf32, #tpu.memory_space<vmem>>, vector<1x64xf32>
    %13 = vector.broadcast %12 : vector<1x64xf32> to vector<256x64xf32>
    %14 = arith.addf %11, %13 : vector<256x64xf32>
    %cst_11 = arith.constant 0.000000e+00 : f32
    %15 = vector.broadcast %cst_11 : f32 to vector<256x64xf32>
    %16 = arith.maximumf %14, %15 : vector<256x64xf32>
    %c0_12 = arith.constant 0 : index
    %c0_13 = arith.constant 0 : index
    %17 = vector.load %arg6[%c0_12, %c0_13] : memref<1x64xf32, #tpu.memory_space<vmem>>, vector<1x64xf32>
    %18 = vector.broadcast %17 : vector<1x64xf32> to vector<256x64xf32>
    %19 = arith.mulf %16, %18 : vector<256x64xf32>
    %cst_14 = arith.constant dense<0.000000e+00> : vector<256xf32>
    %20 = vector.multi_reduction <add>, %19, %cst_14 [1] : vector<256x64xf32> to vector<256xf32>
    %21 = vector.shape_cast %20 : vector<256xf32> to vector<256x1xf32>
    %c0_15 = arith.constant 0 : index
    %c0_16 = arith.constant 0 : index
    %22 = memref.load %arg7[%c0_15, %c0_16] : memref<1x1xf32, #tpu.memory_space<smem>>
    %23 = vector.broadcast %22 : f32 to vector<256x1xf32>
    %24 = arith.addf %21, %23 : vector<256x1xf32>
    %25 = arith.negf %24 : vector<256x1xf32>
    %26 = math.exp %25 : vector<256x1xf32>
    %cst_17 = arith.constant 1.000000e+00 : f32
    %27 = vector.broadcast %cst_17 : f32 to vector<256x1xf32>
    %28 = arith.addf %27, %26 : vector<256x1xf32>
    %29 = arith.divf %27, %28 : vector<256x1xf32>
    %c0_18 = arith.constant 0 : index
    %c0_19 = arith.constant 0 : index
    %30 = vector.load %arg8[%c0_18, %c0_19] : memref<256x1xf32, #tpu.memory_space<vmem>>, vector<256x1xf32>
    tpu.vector_store %arg8[%c0_18, %c0_19], %29 {strides = array<i32>} : memref<256x1xf32, #tpu.memory_space<vmem>>, vector<256x1xf32>,
    return
  }
  func.func @transform_0(%arg0: i32) -> (i32, i32) {
    %c0_i32 = arith.constant 0 : i32
    %c0_i32_0 = arith.constant 0 : i32
    return %arg0, %c0_i32 : i32, i32
  }
  func.func @transform_1(%arg0: i32) -> (i32, i32) {
    %c0_i32 = arith.constant 0 : i32
    %c0_i32_0 = arith.constant 0 : i32
    %c0_i32_1 = arith.constant 0 : i32
    return %c0_i32, %c0_i32_0 : i32, i32
  }
  func.func @transform_2(%arg0: i32) -> (i32, i32) {
    %c0_i32 = arith.constant 0 : i32
    %c0_i32_0 = arith.constant 0 : i32
    %c0_i32_1 = arith.constant 0 : i32
    return %c0_i32, %c0_i32_0 : i32, i32
  }
  func.func @transform_3(%arg0: i32) -> (i32, i32) {
    %c0_i32 = arith.constant 0 : i32
    %c0_i32_0 = arith.constant 0 : i32
    %c0_i32_1 = arith.constant 0 : i32
    return %c0_i32, %c0_i32_0 : i32, i32
  }
  func.func @transform_4(%arg0: i32) -> (i32, i32) {
    %c0_i32 = arith.constant 0 : i32
    %c0_i32_0 = arith.constant 0 : i32
    %c0_i32_1 = arith.constant 0 : i32
    return %c0_i32, %c0_i32_0 : i32, i32
  }
  func.func @transform_5(%arg0: i32) -> (i32, i32) {
    %c0_i32 = arith.constant 0 : i32
    %c0_i32_0 = arith.constant 0 : i32
    %c0_i32_1 = arith.constant 0 : i32
    return %c0_i32, %c0_i32_0 : i32, i32
  }
  func.func @transform_6(%arg0: i32) -> (i32, i32) {
    %c0_i32 = arith.constant 0 : i32
    %c0_i32_0 = arith.constant 0 : i32
    %c0_i32_1 = arith.constant 0 : i32
    return %c0_i32, %c0_i32_0 : i32, i32
  }
  func.func @transform_7(%arg0: i32) -> (i32, i32) {
    %c0_i32 = arith.constant 0 : i32
    %c0_i32_0 = arith.constant 0 : i32
    return %arg0, %c0_i32 : i32, i32
  }
}

</mosaic_0001>

<bundles_post_ra>
// kernel: tpu_custom_call.1
= control target key start
LH: loop header
LB: loop body
LE: loop exit
PB: predicated region body
PF: predicated region fallthrough
CT: control target
= control target key end

     0   :  { %s1739_s26 = smov 0   ;;  %s2086_s0 = inlined_call_operand.vmem [shape: f32[512,32], index: 0, kind: input, shape index: {}]   ;;  %s2087_s1 = inlined_call_operand.vmem [shape: bf16[32,128], index: 1, kind: input, shape index: {}]   ;;  %s2088_s2 = inlined_call_operand.vmem [shape: f32[1,128], index: 2, kind: input, shape index: {}]   ;;  %s2089_s3 = inlined_call_operand.vmem [shape: bf16[128,64], index: 3, kind: input, shape index: {}]   ;;  %s2090_s4 = inlined_call_operand.vmem [shape: f32[1,64], index: 4, kind: input, shape index: {}]   ;;  %s2091_s5 = inlined_call_operand.vmem [shape: f32[1,64], index: 5, kind: input, shape index: {}]   ;;  %s2092_s6 = inlined_call_operand.<no memory space> [shape: f32[1,1], index: 6, kind: input, shape index: {}]   ;;  %s2093_s7 = inlined_call_operand.vmem [shape: f32[512,1], index: 7, kind: output, shape index: {}]  }
   0x1   :  { %12 = sst [smem:[#allocation2]] %s2092_s6 }
   0x2 LB: > { %s1328_s27 = sadd.s32 4294967295, %s1694_s26   ;;  %p1332_p0 = scmp.ge.s32.totalorder %s1694_s26, 1  ;;  %s1694_s26 = sphi %s1739_s26, %s18_s26  }
   0x3   : > { %p239_p1 = scmp.lt.s32.totalorder %s1694_s26, 3 }
   0x5   : > { %p240_p2 = pnand %p1332_p0, %p239_p1 }
   0x6   : > { %v1550_v0 = vld [vmem:[%s2087_s1] sm:$0xff] (!%p240_p2)   ;;  %s1333_s6 = sshll.u32 (!%p240_p2), %s1328_s27, 5  ;;  %v1551_v1 = vld [vmem:[%s2087_s1 + $0x8] sm:$0xff] (!%p240_p2)   ;;  %v1554_v4 = vld [vmem:[%s2089_s3 + $0x10] sm:$0xff] (!%p240_p2)   ;;  %vm355_vm0 = vcmask (!%p240_p2), 261120   ;;  %vm916_vm1 = vcmask (!%p240_p2), 523264  }
   0x7   : > { %243 = sbr.rel (%p240_p2) target bundleno = 699 (0x2bb), region = 48  ;;  %p272_p3 = scmp.lt.s32.totalorder (!%p240_p2), %s1333_s6, 63  ;;  %1442 = vmatprep.subr.bf16.mxu0 (!%p240_p2), %v1550_v0  ;;  %v1552_v2 = vld [vmem:[%s2089_s3] sm:$0xff] (!%p240_p2)   ;;  %v1553_v3 = vld [vmem:[%s2089_s3 + $0x8] sm:$0xff] (!%p240_p2)   ;;  %v1555_v16 = vld [vmem:[%s2089_s3 + $0x18] sm:$0xff] (!%p240_p2)   ;;  %vm1239_vm2 = vcmask (!%p240_p2), 7168  }
   0x8   : > { %1443 = vmatpush3.bf16.msra.mxu0 (!%p240_p2), %v1550_v0  ;;  %1526 = vmatprep.subr.bf16.mxu1 (!%p240_p2), %v1552_v2  ;;  %v1556_v21 = vld [vmem:[%s2089_s3 + $0x20] sm:$0xff] (!%p240_p2)   ;;  %v1557_v24 = vld [vmem:[%s2089_s3 + $0x28] sm:$0xff] (!%p240_p2)   ;;  %v1558_v29 = vld [vmem:[%s2089_s3 + $0x30] sm:$0xff] (!%p240_p2)   ;;  %s1013_s14 = sld [smem:[#allocation2]] (!%p240_p2) }
   0x9   : > { %1444 = vmatprep.subr.bf16.mxu0 (!%p240_p2), %v1551_v1  ;;  %1534 = vmatpush3.bf16.msra.mxu1 (!%p240_p2), %v1552_v2  ;;  %v1559_v57 = vld [vmem:[%s2089_s3 + $0x38] sm:$0xff] (!%p240_p2)   ;;  %v1838_v58 = vld [vmem:[%s2088_s2] ss:$0 sm:$0xff] (!%p240_p2) }
   0xa   : > { %1527 = vmatprep.subr.bf16.mxu1 (!%p240_p2), %v1553_v3 }
   0xc   : > { %1445 = vmatpush3.bf16.msra.mxu0 (!%p240_p2), %v1551_v1 }
   0xd   : > { %1478 = vmatprep.subr.bf16.mxu0 (!%p240_p2), %v1552_v2  ;;  %1535 = vmatpush3.bf16.msra.mxu1 (!%p240_p2), %v1553_v3 }
   0xe   : > { %s2095_s6 = smov (!%p272_p3, %s1333_s6), 63  ;;  %1528 = vmatprep.subr.bf16.mxu1 %v1554_v4 }
   0xf   : > { %s1334_s13 = sshll.u32 %s2095_s6, 3 }
  0x10   : > { %s1767_s16 = scalar_lea.vmem %s2086_s0, %s1334_s13  ;;  %s1997_s17 = scalar_lea.vmem %s2093_s7, %s1334_s13 }
  0x11   : > { %v284_v5 = vld [vmem:[%s1767_s16] sm:$0xff]  ;;  %v285_v6 = vld [vmem:[%s1767_s16 + $0x8] sm:$0xff]  ;;  %v286_v7 = vld [vmem:[%s1767_s16 + $0x10] sm:$0xff]  ;;  %1536 = vmatpush3.bf16.msra.mxu1 %v1554_v4 }
  0x12   : > { %v316_v8 = vpack.c.bf16 %v285_v6, %v284_v5  ;;  %v287_v9 = vld [vmem:[%s1767_s16 + $0x18] sm:$0xff]  ;;  %v288_v10 = vld [vmem:[%s1767_s16 + $0x20] sm:$0xff]  ;;  %v289_v11 = vld [vmem:[%s1767_s16 + $0x28] sm:$0xff]  ;;  %1529 = vmatprep.subr.bf16.mxu1 %v1555_v16 }
  0x13   : > { %v317_v12 = vpack.c.bf16 %v287_v9, %v286_v7  ;;  %v318_v13 = vpack.c.bf16 %v289_v11, %v288_v10  ;;  %v290_v14 = vld [vmem:[%s1767_s16 + $0x30] sm:$0xff]  ;;  %v291_v15 = vld [vmem:[%s1767_s16 + $0x38] sm:$0xff]  ;;  %v292_v17 = vld [vmem:[%s1767_s16 + $0x40] sm:$0xff] }
  0x14   : > { %1446 = vmatprep.mubr.msk.bf16.mxu0 %vm355_vm0, %v316_v8  ;;  %v293_v18 = vld [vmem:[%s1767_s16 + $0x48] sm:$0xff]  ;;  %v319_v19 = vpack.c.bf16 %v291_v15, %v290_v14  ;;  %v294_v22 = vld [vmem:[%s1767_s16 + $0x50] sm:$0xff]  ;;  %v295_v23 = vld [vmem:[%s1767_s16 + $0x58] sm:$0xff] }
  0x15   : > { %1447 = vmatmul.mubr.msk.bf16.vlgmr.msra.gmra.mrb[0].mxu0 %vm355_vm0, %v317_v12  ;;  %v320_v20 = vpack.c.bf16 %v293_v18, %v292_v17  ;;  %1537 = vmatpush3.bf16.msra.mxu1 %v1555_v16  ;;  %v296_v25 = vld [vmem:[%s1767_s16 + $0x60] sm:$0xff]  ;;  %v297_v26 = vld [vmem:[%s1767_s16 + $0x68] sm:$0xff]  ;;  %v321_v27 = vpack.c.bf16 %v295_v23, %v294_v22  ;;  %v298_v30 = vld [vmem:[%s1767_s16 + $0x70] sm:$0xff] }
  0x16   : > { %1450 = vmatprep.mubr.msk.bf16.mxu0 %vm355_vm0, %v318_v13  ;;  %1479 = vmatpush3.bf16.msra.mxu0 %v1552_v2  ;;  %v322_v28 = vpack.c.bf16 %v297_v26, %v296_v25  ;;  %v299_v31 = vld [vmem:[%s1767_s16 + $0x78] sm:$0xff]  ;;  %v300_v32 = vld [vmem:[%s1767_s16 + $0x80] sm:$0xff]  ;;  %v301_v33 = vld [vmem:[%s1767_s16 + $0x88] sm:$0xff] }
  0x17   : > { %1480 = vmatprep.subr.bf16.mxu0 %v1553_v3  ;;  %1530 = vmatprep.subr.bf16.mxu1 %v1556_v21  ;;  %v323_v34 = vpack.c.bf16 %v299_v31, %v298_v30  ;;  %v324_v35 = vpack.c.bf16 %v301_v33, %v300_v32  ;;  %v302_v36 = vld [vmem:[%s1767_s16 + $0x90] sm:$0xff]  ;;  %v303_v37 = vld [vmem:[%s1767_s16 + $0x98] sm:$0xff]  ;;  %v304_v38 = vld [vmem:[%s1767_s16 + $0xa0] sm:$0xff] }
  0x18   : > { %v305_v39 = vld [vmem:[%s1767_s16 + $0xa8] sm:$0xff]  ;;  %v325_v40 = vpack.c.bf16 %v303_v37, %v302_v36  ;;  %v306_v42 = vld [vmem:[%s1767_s16 + $0xb0] sm:$0xff]  ;;  %v307_v43 = vld [vmem:[%s1767_s16 + $0xb8] sm:$0xff] }
  0x19   : > { %1538 = vmatpush3.bf16.msra.mxu1 %v1556_v21  ;;  %v326_v41 = vpack.c.bf16 %v305_v39, %v304_v38  ;;  %v308_v44 = vld [vmem:[%s1767_s16 + $0xc0] sm:$0xff]  ;;  %v309_v45 = vld [vmem:[%s1767_s16 + $0xc8] sm:$0xff]  ;;  %v327_v46 = vpack.c.bf16 %v307_v43, %v306_v42  ;;  %v310_v48 = vld [vmem:[%s1767_s16 + $0xd0] sm:$0xff] }
  0x1a   : > { %1481 = vmatpush3.bf16.msra.mxu0 %v1553_v3  ;;  %1531 = vmatprep.subr.bf16.mxu1 %v1557_v24  ;;  %v328_v47 = vpack.c.bf16 %v309_v45, %v308_v44  ;;  %v311_v49 = vld [vmem:[%s1767_s16 + $0xd8] sm:$0xff]  ;;  %v312_v50 = vld [vmem:[%s1767_s16 + $0xe0] sm:$0xff]  ;;  %v313_v51 = vld [vmem:[%s1767_s16 + $0xe8] sm:$0xff] }
  0x1b   : > { %1482 = vmatprep.subr.bf16.mxu0 %v1554_v4  ;;  %v329_v52 = vpack.c.bf16 %v311_v49, %v310_v48  ;;  %v330_v53 = vpack.c.bf16 %v313_v51, %v312_v50  ;;  %v314_v54 = vld [vmem:[%s1767_s16 + $0xf0] sm:$0xff]  ;;  %v315_v55 = vld [vmem:[%s1767_s16 + $0xf8] sm:$0xff] }
  0x1c   : > { %v331_v56 = vpack.c.bf16 %v315_v55, %v314_v54 }
  0x1d   : > { %1451 = vmatmul.mubr.msk.bf16.gmra.mrb[4].mxu0 %vm355_vm0, %v319_v19  ;;  %1539 = vmatpush3.bf16.msra.mxu1 %v1557_v24 }
  0x1e   : > { %1454 = vmatprep.mubr.msk.bf16.mxu0 %vm355_vm0, %v320_v20  ;;  %1483 = vmatpush3.bf16.msra.mxu0 %v1554_v4 }
  0x1f   : > { %1484 = vmatprep.subr.bf16.mxu0 %v1555_v16  ;;  %1532 = vmatprep.subr.bf16.mxu1 %v1558_v29 }
  0x21   : > { %1540 = vmatpush3.bf16.msra.mxu1 %v1558_v29 }
  0x22   : > { %1485 = vmatpush3.bf16.msra.mxu0 %v1555_v16  ;;  %1533 = vmatprep.subr.bf16.mxu1 %v1559_v57 }
  0x23   : > { %1486 = vmatprep.subr.bf16.mxu0 %v1556_v21 }
  0x25   : > { %1455 = vmatmul.mubr.msk.bf16.gmra.mrb[8].mxu0 %vm355_vm0, %v321_v27  ;;  %1541 = vmatpush3.bf16.msra.mxu1 %v1559_v57 }
  0x26   : > { %1458 = vmatprep.mubr.msk.bf16.mxu0 %vm355_vm0, %v322_v28  ;;  %1487 = vmatpush3.bf16.msra.mxu0 %v1556_v21 }
  0x27   : > { %1488 = vmatprep.subr.bf16.mxu0 %v1557_v24 }
  0x2a   : > { %1489 = vmatpush3.bf16.msra.mxu0 %v1557_v24 }
  0x2b   : > { %1490 = vmatprep.subr.bf16.mxu0 %v1558_v29 }
  0x2d   : > { %1459 = vmatmul.mubr.msk.bf16.gmra.mrb[12].mxu0 %vm355_vm0, %v323_v34 }
  0x2e   : > { %1462 = vmatprep.mubr.msk.bf16.mxu0 %vm355_vm0, %v324_v35  ;;  %1491 = vmatpush3.bf16.msra.mxu0 %v1558_v29 }
  0x2f   : > { %1492 = vmatprep.subr.bf16.mxu0 %v1559_v57 }
  0x32   : > { %1493 = vmatpush3.bf16.msra.mxu0 %v1559_v57 }
  0x35   : > { %1463 = vmatmul.mubr.msk.bf16.gmra.mrb[16].mxu0 %vm355_vm0, %v325_v40 }
  0x36   : > { %1466 = vmatprep.mubr.msk.bf16.mxu0 %vm355_vm0, %v326_v41 }
  0x3d   : > { %1467 = vmatmul.mubr.msk.bf16.gmra.mrb[20].mxu0 %vm355_vm0, %v327_v46 }
  0x3e   : > { %1470 = vmatprep.mubr.msk.bf16.mxu0 %vm355_vm0, %v328_v47 }
  0x45   : > { %1471 = vmatmul.mubr.msk.bf16.gmra.mrb[24].mxu0 %vm355_vm0, %v329_v52 }
  0x46   : > { %1474 = vmatprep.mubr.msk.bf16.mxu0 %vm355_vm0, %v330_v53 }
  0x4d   : > { %1475 = vmatmul.mubr.msk.bf16.gmra.mrb[28].mxu0 %vm355_vm0, %v331_v56 }
  0xe8   : > { %v1448_v59 = vpop.f32.mrb[0].mxu0 }
  0xe9   : > { %v447_v60 = vadd.f32 %v1448_v59, %v1838_v58  ;;  %v438_v61 = vpop.f32.mrb[1].mxu0 }
  0xea   : > { %v439_v62 = vadd.f32 %v1838_v58, %v438_v61  ;;  %v1449_v63 = vpop.f32.mrb[2].mxu0 }
  0xeb   : > { %v450_v0 = vadd.f32 %v1449_v63, %v1838_v58  ;;  %v441_v1 = vpop.f32.mrb[3].mxu0  ;;  %v567_v3 = vmax.f32 %v447_v60, 0.0 }
  0xec   : > { %v442_v2 = vadd.f32 %v1838_v58, %v441_v1  ;;  %v565_v5 = vmax.f32 %v439_v62, 0.0 }
  0xed   : > { %v568_v4 = vmax.f32 %v450_v0, 0.0 }
  0xee   : > { %v566_v6 = vmax.f32 %v442_v2, 0.0 }
  0xef   : > { %v598_v7 = vpack.c.bf16 %v568_v4, %v567_v3 }
  0xf0   : > { %v597_v8 = vpack.c.bf16 %v566_v6, %v565_v5  ;;  %v1452_v9 = vpop.f32.mrb[4].mxu0 }
  0xf1   : > { %v463_v10 = vadd.f32 %v1452_v9, %v1838_v58  ;;  %v454_v11 = vpop.f32.mrb[5].mxu0 }
  0xf2   : > { %v455_v12 = vadd.f32 %v1838_v58, %v454_v11  ;;  %v1453_v13 = vpop.f32.mrb[6].mxu0  ;;  %1494 = vmatprep.mubr.bf16.mxu0 %v597_v8 }
  0xf3   : > { %v466_v14 = vadd.f32 %v1453_v13, %v1838_v58  ;;  %v457_v15 = vpop.f32.mrb[7].mxu0  ;;  %1495 = vmatmul.mubr.bf16.vlgmr.msra.gmra.mrb[32].mxu0 %v598_v7  ;;  %v571_v17 = vmax.f32 %v463_v10, 0.0 }
  0xf4   : > { %v458_v16 = vadd.f32 %v1838_v58, %v457_v15  ;;  %v569_v19 = vmax.f32 %v455_v12, 0.0 }
  0xf5   : > { %v572_v18 = vmax.f32 %v466_v14, 0.0 }
  0xf6   : > { %v570_v20 = vmax.f32 %v458_v16, 0.0 }
  0xf7   : > { %v600_v21 = vpack.c.bf16 %v572_v18, %v571_v17 }
  0xf8   : > { %v1456_v22 = vpop.f32.mrb[8].mxu0  ;;  %v599_v23 = vpack.c.bf16 %v570_v20, %v569_v19 }
  0xf9   : > { %v479_v24 = vadd.f32 %v1456_v22, %v1838_v58  ;;  %v470_v25 = vpop.f32.mrb[9].mxu0 }
  0xfa   : > { %v471_v26 = vadd.f32 %v1838_v58, %v470_v25  ;;  %v1457_v27 = vpop.f32.mrb[10].mxu0  ;;  %1498 = vmatprep.mubr.bf16.mxu1 %v599_v23 }
  0xfb   : > { %v482_v28 = vadd.f32 %v1457_v27, %v1838_v58  ;;  %v473_v29 = vpop.f32.mrb[11].mxu0  ;;  %1499 = vmatmul.mubr.bf16.vlgmr.msra.gmra.mrb[0].mxu1 %v600_v21  ;;  %v575_v31 = vmax.f32 %v479_v24, 0.0 }
  0xfc   : > { %v474_v30 = vadd.f32 %v1838_v58, %v473_v29  ;;  %v573_v33 = vmax.f32 %v471_v26, 0.0 }
  0xfd   : > { %v576_v32 = vmax.f32 %v482_v28, 0.0 }
  0xfe   : > { %v574_v34 = vmax.f32 %v474_v30, 0.0 }
  0xff   : > { %v602_v35 = vpack.c.bf16 %v576_v32, %v575_v31 }
 0x100   : > { %v601_v36 = vpack.c.bf16 %v574_v34, %v573_v33  ;;  %v1460_v37 = vpop.f32.mrb[12].mxu0 }
 0x101   : > { %v495_v38 = vadd.f32 %v1460_v37, %v1838_v58  ;;  %v486_v39 = vpop.f32.mrb[13].mxu0 }
 0x102   : > { %v487_v40 = vadd.f32 %v1838_v58, %v486_v39  ;;  %v1461_v41 = vpop.f32.mrb[14].mxu0  ;;  %1502 = vmatprep.mubr.bf16.mxu1 %v601_v36 }
 0x103   : > { %v498_v42 = vadd.f32 %v1461_v41, %v1838_v58  ;;  %v489_v43 = vpop.f32.mrb[15].mxu0  ;;  %1503 = vmatmul.mubr.bf16.gmra.mrb[4].mxu1 %v602_v35  ;;  %v579_v45 = vmax.f32 %v495_v38, 0.0 }
 0x104   : > { %v490_v44 = vadd.f32 %v1838_v58, %v489_v43  ;;  %v577_v47 = vmax.f32 %v487_v40, 0.0 }
 0x105   : > { %v580_v46 = vmax.f32 %v498_v42, 0.0 }
 0x106   : > { %v578_v48 = vmax.f32 %v490_v44, 0.0  ;;  %v1875_v44 = vld [vmem:[%s2090_s4] ss:$0 sm:$0xff] }
 0x107   : > { %v604_v49 = vpack.c.bf16 %v580_v46, %v579_v45 }
 0x108   : > { %v603_v50 = vpack.c.bf16 %v578_v48, %v577_v47  ;;  %v1464_v51 = vpop.f32.mrb[16].mxu0 }
 0x109   : > { %v511_v52 = vadd.f32 %v1464_v51, %v1838_v58  ;;  %v502_v53 = vpop.f32.mrb[17].mxu0 }
 0x10a   : > { %v503_v54 = vadd.f32 %v1838_v58, %v502_v53  ;;  %v1465_v55 = vpop.f32.mrb[18].mxu0  ;;  %1506 = vmatprep.mubr.bf16.mxu1 %v603_v50 }
 0x10b   : > { %v514_v56 = vadd.f32 %v1465_v55, %v1838_v58  ;;  %v505_v57 = vpop.f32.mrb[19].mxu0  ;;  %1507 = vmatmul.mubr.bf16.gmra.mrb[8].mxu1 %v604_v49  ;;  %v583_v60 = vmax.f32 %v511_v52, 0.0  ;;  %v1882_v49 = vld [vmem:[%s2091_s5] ss:$0 sm:$0xff] }
 0x10c   : > { %v506_v59 = vadd.f32 %v1838_v58, %v505_v57  ;;  %v581_v62 = vmax.f32 %v503_v54, 0.0 }
 0x10d   : > { %v584_v61 = vmax.f32 %v514_v56, 0.0 }
 0x10e   : > { %v582_v63 = vmax.f32 %v506_v59, 0.0 }
 0x10f   : > { %v606_v0 = vpack.c.bf16 %v584_v61, %v583_v60 }
 0x110   : > { %v605_v1 = vpack.c.bf16 %v582_v63, %v581_v62  ;;  %v1468_v2 = vpop.f32.mrb[20].mxu0 }
 0x111   : > { %v527_v3 = vadd.f32 %v1468_v2, %v1838_v58  ;;  %v518_v4 = vpop.f32.mrb[21].mxu0 }
 0x112   : > { %v519_v5 = vadd.f32 %v1838_v58, %v518_v4  ;;  %v1469_v6 = vpop.f32.mrb[22].mxu0  ;;  %1510 = vmatprep.mubr.bf16.mxu1 %v605_v1 }
 0x113   : > { %v530_v7 = vadd.f32 %v1469_v6, %v1838_v58  ;;  %v521_v8 = vpop.f32.mrb[23].mxu0  ;;  %1511 = vmatmul.mubr.bf16.gmra.mrb[12].mxu1 %v606_v0  ;;  %v587_v10 = vmax.f32 %v527_v3, 0.0 }
 0x114   : > { %v522_v9 = vadd.f32 %v1838_v58, %v521_v8  ;;  %v585_v12 = vmax.f32 %v519_v5, 0.0 }
 0x115   : > { %v588_v11 = vmax.f32 %v530_v7, 0.0 }
 0x116   : > { %v586_v13 = vmax.f32 %v522_v9, 0.0 }
 0x117   : > { %v608_v14 = vpack.c.bf16 %v588_v11, %v587_v10 }
 0x118   : > { %v607_v15 = vpack.c.bf16 %v586_v13, %v585_v12  ;;  %v1472_v16 = vpop.f32.mrb[24].mxu0 }
 0x119   : > { %v543_v17 = vadd.f32 %v1472_v16, %v1838_v58  ;;  %v534_v18 = vpop.f32.mrb[25].mxu0 }
 0x11a   : > { %v535_v19 = vadd.f32 %v1838_v58, %v534_v18  ;;  %v1473_v20 = vpop.f32.mrb[26].mxu0  ;;  %1514 = vmatprep.mubr.bf16.mxu1 %v607_v15 }
 0x11b   : > { %v546_v21 = vadd.f32 %v1473_v20, %v1838_v58  ;;  %v537_v22 = vpop.f32.mrb[27].mxu0  ;;  %1515 = vmatmul.mubr.bf16.gmra.mrb[16].mxu1 %v608_v14  ;;  %v591_v24 = vmax.f32 %v543_v17, 0.0 }
 0x11c   : > { %v538_v23 = vadd.f32 %v1838_v58, %v537_v22  ;;  %v589_v26 = vmax.f32 %v535_v19, 0.0 }
 0x11d   : > { %v592_v25 = vmax.f32 %v546_v21, 0.0 }
 0x11e   : > { %v590_v27 = vmax.f32 %v538_v23, 0.0 }
 0x11f   : > { %v610_v28 = vpack.c.bf16 %v592_v25, %v591_v24 }
 0x120   : > { %v609_v29 = vpack.c.bf16 %v590_v27, %v589_v26  ;;  %v1476_v30 = vpop.f32.mrb[28].mxu0 }
 0x121   : > { %v559_v31 = vadd.f32 %v1476_v30, %v1838_v58  ;;  %v550_v32 = vpop.f32.mrb[29].mxu0 }
 0x122   : > { %v551_v33 = vadd.f32 %v1838_v58, %v550_v32  ;;  %v1477_v34 = vpop.f32.mrb[30].mxu0  ;;  %1518 = vmatprep.mubr.bf16.mxu1 %v609_v29 }
 0x123   : > { %v562_v35 = vadd.f32 %v1477_v34, %v1838_v58  ;;  %v553_v36 = vpop.f32.mrb[31].mxu0  ;;  %1519 = vmatmul.mubr.bf16.gmra.mrb[20].mxu1 %v610_v28  ;;  %v595_v38 = vmax.f32 %v559_v31, 0.0 }
 0x124   : > { %v554_v37 = vadd.f32 %v1838_v58, %v553_v36  ;;  %v593_v40 = vmax.f32 %v551_v33, 0.0 }
 0x125   : > { %v596_v39 = vmax.f32 %v562_v35, 0.0 }
 0x126   : > { %v594_v41 = vmax.f32 %v554_v37, 0.0 }
 0x127   : > { %v612_v42 = vpack.c.bf16 %v596_v39, %v595_v38 }
 0x128   : > { %v611_v43 = vpack.c.bf16 %v594_v41, %v593_v40 }
 0x12a   : > { %1522 = vmatprep.mubr.bf16.mxu1 %v611_v43 }
 0x12b   : > { %1523 = vmatmul.mubr.bf16.gmra.mrb[24].mxu1 %v612_v42 }
 0x1c6   : > { %v1496_v45 = vpop.f32.mrb[32].mxu0 }
 0x1c7   : > { %v727_v46 = vadd.f32 %v1496_v45, %v1875_v44  ;;  %v718_v47 = vpop.f32.mrb[33].mxu0 }
 0x1c8   : > { %v719_v48 = vadd.f32 %v1875_v44, %v718_v47  ;;  %v1497_v58 = vpop.f32.mrb[34].mxu0 }
 0x1c9   : > { %v847_v50 = vmax.f32 %v727_v46, 0.0  ;;  %v730_v51 = vadd.f32 %v1497_v58, %v1875_v44  ;;  %v721_v52 = vpop.f32.mrb[35].mxu0 }
 0x1ca   : > { %v845_v53 = vmax.f32 %v719_v48, 0.0  ;;  %v722_v54 = vadd.f32 %v1875_v44, %v721_v52 }
 0x1cb   : > { %v848_v55 = vmax.f32 %v730_v51, 0.0  ;;  %v886_v56 = vmul.f32 %v1882_v49, %v847_v50 }
 0x1cc   : > { %v846_v57 = vmax.f32 %v722_v54, 0.0  ;;  %v884_v59 = vmul.f32 %v1882_v49, %v845_v53 }
 0x1cd   : > { %v923_v60 = vsel %vm916_vm1, %v886_v56, 0.0  ;;  %v887_v61 = vmul.f32 %v1882_v49, %v848_v55 }
 0x1ce   : > { %v1500_v62 = vpop.f32.mrb[0].mxu1  ;;  %924 = vadd.xlane.f32.xlu1 %v923_v60  ;;  %v917_v63 = vsel %vm916_vm1, %v884_v59, 0.0  ;;  %v885_v0 = vmul.f32 %v1882_v49, %v846_v57 }
 0x1cf   : > { %v743_v1 = vadd.f32 %v1500_v62, %v1875_v44  ;;  %v734_v2 = vpop.f32.mrb[1].mxu1  ;;  %918 = vadd.xlane.f32.xlu0 %v917_v63  ;;  %v926_v8 = vsel %vm916_vm1, %v887_v61, 0.0 }
 0x1d0   : > { %v735_v3 = vadd.f32 %v1875_v44, %v734_v2  ;;  %v1501_v4 = vpop.f32.mrb[2].mxu1  ;;  %v920_v11 = vsel %vm916_vm1, %v885_v0, 0.0 }
 0x1d1   : > { %v851_v5 = vmax.f32 %v743_v1, 0.0  ;;  %v746_v6 = vadd.f32 %v1501_v4, %v1875_v44  ;;  %v737_v7 = vpop.f32.mrb[3].mxu1 }
 0x1d2   : > { %v849_v9 = vmax.f32 %v735_v3, 0.0  ;;  %v738_v10 = vadd.f32 %v1875_v44, %v737_v7  ;;  %927 = vadd.xlane.f32.xlu1 %v926_v8 }
 0x1d3   : > { %v852_v12 = vmax.f32 %v746_v6, 0.0  ;;  %921 = vadd.xlane.f32.xlu0 %v920_v11  ;;  %v890_v13 = vmul.f32 %v1882_v49, %v851_v5 }
 0x1d4   : > { %v850_v14 = vmax.f32 %v738_v10, 0.0  ;;  %v888_v18 = vmul.f32 %v1882_v49, %v849_v9 }
 0x1d5   : > { %v935_v15 = vsel %vm916_vm1, %v890_v13, 0.0  ;;  %v891_v16 = vmul.f32 %v1882_v49, %v852_v12 }
 0x1d6   : > { %v1504_v17 = vpop.f32.mrb[4].mxu1  ;;  %v889_v22 = vmul.f32 %v1882_v49, %v850_v14  ;;  %v929_v30 = vsel %vm916_vm1, %v888_v18, 0.0 }
 0x1d7   : > { %v759_v19 = vadd.f32 %v1504_v17, %v1875_v44  ;;  %v750_v20 = vpop.f32.mrb[5].mxu1  ;;  %936 = vadd.xlane.f32.xlu0 %v935_v15  ;;  %v938_v21 = vsel %vm916_vm1, %v891_v16, 0.0 }
 0x1d8   : > { %v751_v23 = vadd.f32 %v1875_v44, %v750_v20  ;;  %v1505_v24 = vpop.f32.mrb[6].mxu1  ;;  %939 = vadd.xlane.f32.xlu1 %v938_v21  ;;  %v932_v32 = vsel %vm916_vm1, %v889_v22, 0.0 }
 0x1d9   : > { %v855_v25 = vmax.f32 %v759_v19, 0.0  ;;  %v762_v26 = vadd.f32 %v1505_v24, %v1875_v44  ;;  %v753_v27 = vpop.f32.mrb[7].mxu1 }
 0x1da   : > { %v853_v28 = vmax.f32 %v751_v23, 0.0  ;;  %v754_v29 = vadd.f32 %v1875_v44, %v753_v27 }
 0x1db   : > { %v856_v31 = vmax.f32 %v762_v26, 0.0  ;;  %930 = vadd.xlane.f32.xlu0 %v929_v30  ;;  %v894_v33 = vmul.f32 %v1882_v49, %v855_v25 }
 0x1dc   : > { %v854_v34 = vmax.f32 %v754_v29, 0.0  ;;  %933 = vadd.xlane.f32.xlu1 %v932_v32  ;;  %v892_v38 = vmul.f32 %v1882_v49, %v853_v28 }
 0x1dd   : > { %v947_v35 = vsel %vm916_vm1, %v894_v33, 0.0  ;;  %v895_v36 = vmul.f32 %v1882_v49, %v856_v31 }
 0x1de   : > { %v1508_v37 = vpop.f32.mrb[8].mxu1  ;;  %v893_v42 = vmul.f32 %v1882_v49, %v854_v34  ;;  %v941_v51 = vsel %vm916_vm1, %v892_v38, 0.0 }
 0x1df   : > { %v775_v39 = vadd.f32 %v1508_v37, %v1875_v44  ;;  %v766_v40 = vpop.f32.mrb[9].mxu1  ;;  %948 = vadd.xlane.f32.xlu0 %v947_v35  ;;  %v950_v41 = vsel %vm916_vm1, %v895_v36, 0.0 }
 0x1e0   : > { %v767_v43 = vadd.f32 %v1875_v44, %v766_v40  ;;  %v1509_v45 = vpop.f32.mrb[10].mxu1  ;;  %951 = vadd.xlane.f32.xlu1 %v950_v41  ;;  %v944_v53 = vsel %vm916_vm1, %v893_v42, 0.0 }
 0x1e1   : > { %v859_v46 = vmax.f32 %v775_v39, 0.0  ;;  %v778_v47 = vadd.f32 %v1509_v45, %v1875_v44  ;;  %v769_v48 = vpop.f32.mrb[11].mxu1 }
 0x1e2   : > { %v857_v58 = vmax.f32 %v767_v43, 0.0  ;;  %v770_v50 = vadd.f32 %v1875_v44, %v769_v48 }
 0x1e3   : > { %v860_v52 = vmax.f32 %v778_v47, 0.0  ;;  %942 = vadd.xlane.f32.xlu0 %v941_v51  ;;  %v898_v54 = vmul.f32 %v1882_v49, %v859_v46 }
 0x1e4   : > { %v858_v55 = vmax.f32 %v770_v50, 0.0  ;;  %945 = vadd.xlane.f32.xlu1 %v944_v53  ;;  %v896_v60 = vmul.f32 %v1882_v49, %v857_v58 }
 0x1e5   : > { %v959_v56 = vsel %vm916_vm1, %v898_v54, 0.0  ;;  %v899_v57 = vmul.f32 %v1882_v49, %v860_v52 }
 0x1e6   : > { %v1512_v59 = vpop.f32.mrb[12].mxu1  ;;  %v897_v0 = vmul.f32 %v1882_v49, %v858_v55  ;;  %v953_v8 = vsel %vm916_vm1, %v896_v60, 0.0 }
 0x1e7   : > { %v791_v61 = vadd.f32 %v1512_v59, %v1875_v44  ;;  %v782_v62 = vpop.f32.mrb[13].mxu1  ;;  %960 = vadd.xlane.f32.xlu0 %v959_v56  ;;  %v962_v63 = vsel %vm916_vm1, %v899_v57, 0.0 }
 0x1e8   : > { %v783_v1 = vadd.f32 %v1875_v44, %v782_v62  ;;  %v1513_v2 = vpop.f32.mrb[14].mxu1  ;;  %963 = vadd.xlane.f32.xlu1 %v962_v63  ;;  %v956_v10 = vsel %vm916_vm1, %v897_v0, 0.0 }
 0x1e9   : > { %v863_v3 = vmax.f32 %v791_v61, 0.0  ;;  %v794_v4 = vadd.f32 %v1513_v2, %v1875_v44  ;;  %v785_v5 = vpop.f32.mrb[15].mxu1 }
 0x1ea   : > { %v861_v6 = vmax.f32 %v783_v1, 0.0  ;;  %v786_v7 = vadd.f32 %v1875_v44, %v785_v5 }
 0x1eb   : > { %v864_v9 = vmax.f32 %v794_v4, 0.0  ;;  %954 = vadd.xlane.f32.xlu0 %v953_v8  ;;  %v902_v11 = vmul.f32 %v1882_v49, %v863_v3 }
 0x1ec   : > { %v862_v12 = vmax.f32 %v786_v7, 0.0  ;;  %957 = vadd.xlane.f32.xlu1 %v956_v10  ;;  %v900_v16 = vmul.f32 %v1882_v49, %v861_v6 }
 0x1ed   : > { %v971_v13 = vsel %vm916_vm1, %v902_v11, 0.0  ;;  %v903_v14 = vmul.f32 %v1882_v49, %v864_v9 }
 0x1ee   : > { %v1516_v15 = vpop.f32.mrb[16].mxu1  ;;  %v901_v20 = vmul.f32 %v1882_v49, %v862_v12  ;;  %v965_v28 = vsel %vm916_vm1, %v900_v16, 0.0 }
 0x1ef   : > { %v807_v17 = vadd.f32 %v1516_v15, %v1875_v44  ;;  %v798_v18 = vpop.f32.mrb[17].mxu1  ;;  %972 = vadd.xlane.f32.xlu0 %v971_v13  ;;  %v974_v19 = vsel %vm916_vm1, %v903_v14, 0.0 }
 0x1f0   : > { %v799_v21 = vadd.f32 %v1875_v44, %v798_v18  ;;  %v1517_v22 = vpop.f32.mrb[18].mxu1  ;;  %975 = vadd.xlane.f32.xlu1 %v974_v19  ;;  %v968_v30 = vsel %vm916_vm1, %v901_v20, 0.0 }
 0x1f1   : > { %v867_v23 = vmax.f32 %v807_v17, 0.0  ;;  %v810_v24 = vadd.f32 %v1517_v22, %v1875_v44  ;;  %v801_v25 = vpop.f32.mrb[19].mxu1  ;;  %v1978_v17 = vstv %s1013_s14 }
 0x1f2   : > { %v865_v26 = vmax.f32 %v799_v21, 0.0  ;;  %v802_v27 = vadd.f32 %v1875_v44, %v801_v25 }
 0x1f3   : > { %v868_v29 = vmax.f32 %v810_v24, 0.0  ;;  %966 = vadd.xlane.f32.xlu0 %v965_v28  ;;  %v906_v31 = vmul.f32 %v1882_v49, %v867_v23 }
 0x1f4   : > { %v866_v32 = vmax.f32 %v802_v27, 0.0  ;;  %969 = vadd.xlane.f32.xlu1 %v968_v30  ;;  %v904_v36 = vmul.f32 %v1882_v49, %v865_v26 }
 0x1f5   : > { %v983_v33 = vsel %vm916_vm1, %v906_v31, 0.0  ;;  %v907_v34 = vmul.f32 %v1882_v49, %v868_v29 }
 0x1f6   : > { %v1520_v35 = vpop.f32.mrb[20].mxu1  ;;  %v905_v40 = vmul.f32 %v1882_v49, %v866_v32  ;;  %v977_v58 = vsel %vm916_vm1, %v904_v36, 0.0 }
 0x1f7   : > { %v823_v37 = vadd.f32 %v1520_v35, %v1875_v44  ;;  %v814_v38 = vpop.f32.mrb[21].mxu1  ;;  %984 = vadd.xlane.f32.xlu0 %v983_v33  ;;  %v986_v39 = vsel %vm916_vm1, %v907_v34, 0.0 }
 0x1f8   : > { %v815_v41 = vadd.f32 %v1875_v44, %v814_v38  ;;  %v1521_v42 = vpop.f32.mrb[22].mxu1  ;;  %987 = vadd.xlane.f32.xlu1 %v986_v39  ;;  %v980_v51 = vsel %vm916_vm1, %v905_v40, 0.0 }
 0x1f9   : > { %v871_v43 = vmax.f32 %v823_v37, 0.0  ;;  %v826_v45 = vadd.f32 %v1521_v42, %v1875_v44  ;;  %v817_v46 = vpop.f32.mrb[23].mxu1 }
 0x1fa   : > { %v869_v47 = vmax.f32 %v815_v41, 0.0  ;;  %v818_v48 = vadd.f32 %v1875_v44, %v817_v46 }
 0x1fb   : > { %v872_v50 = vmax.f32 %v826_v45, 0.0  ;;  %978 = vadd.xlane.f32.xlu0 %v977_v58  ;;  %v910_v52 = vmul.f32 %v1882_v49, %v871_v43 }
 0x1fc   : > { %v870_v53 = vmax.f32 %v818_v48, 0.0  ;;  %981 = vadd.xlane.f32.xlu1 %v980_v51  ;;  %v908_v57 = vmul.f32 %v1882_v49, %v869_v47 }
 0x1fd   : > { %v995_v54 = vsel %vm916_vm1, %v910_v52, 0.0  ;;  %v911_v55 = vmul.f32 %v1882_v49, %v872_v50 }
 0x1fe   : > { %v1524_v56 = vpop.f32.mrb[24].mxu1  ;;  %v909_v62 = vmul.f32 %v1882_v49, %v870_v53  ;;  %v989_v6 = vsel %vm916_vm1, %v908_v57, 0.0 }
 0x1ff   : > { %v839_v59 = vadd.f32 %v1524_v56, %v1875_v44  ;;  %v830_v60 = vpop.f32.mrb[25].mxu1  ;;  %996 = vadd.xlane.f32.xlu0 %v995_v54  ;;  %v998_v61 = vsel %vm916_vm1, %v911_v55, 0.0 }
 0x200   : > { %v831_v63 = vadd.f32 %v1875_v44, %v830_v60  ;;  %v1525_v0 = vpop.f32.mrb[26].mxu1  ;;  %999 = vadd.xlane.f32.xlu1 %v998_v61  ;;  %v992_v7 = vsel %vm916_vm1, %v909_v62, 0.0 }
 0x201   : > { %v842_v1 = vadd.f32 %v1525_v0, %v1875_v44  ;;  %v833_v2 = vpop.f32.mrb[27].mxu1  ;;  %v875_v3 = vmax.f32 %v839_v59, 0.0 }
 0x202   : > { %v873_v4 = vmax.f32 %v831_v63, 0.0  ;;  %v834_v5 = vadd.f32 %v1875_v44, %v833_v2 }
 0x203   : > { %990 = vadd.xlane.f32.xlu0 %v989_v6  ;;  %v876_v8 = vmax.f32 %v842_v1, 0.0  ;;  %v914_v13 = vmul.f32 %v1882_v49, %v875_v3 }
 0x204   : > { %v874_v9 = vmax.f32 %v834_v5, 0.0  ;;  %993 = vadd.xlane.f32.xlu1 %v992_v7  ;;  %v912_v10 = vmul.f32 %v1882_v49, %v873_v4 }
 0x205   : > { %v915_v44 = vmul.f32 %v1882_v49, %v876_v8  ;;  %v1007_v15 = vsel %vm916_vm1, %v914_v13, 0.0 }
 0x206   : > { %v1001_v11 = vsel %vm916_vm1, %v912_v10, 0.0  ;;  %v913_v12 = vmul.f32 %v1882_v49, %v874_v9 }
 0x207   : > { %1002 = vadd.xlane.f32.xlu0 %v1001_v11  ;;  %v1010_v16 = vsel %vm916_vm1, %v915_v44, 0.0 }
 0x208   : > { %v1004_v14 = vsel %vm916_vm1, %v913_v12, 0.0 }
 0x209   : > { %1005 = vadd.xlane.f32.xlu1 %v1004_v14 }
 0x20b   : > { %1008 = vadd.xlane.f32.xlu0 %v1007_v15 }
 0x20d   : > { %1011 = vadd.xlane.f32.xlu1 %v1010_v16 }
 0x25b   : > { %v925_v18 = vpop.xlane.xlu1 %924 }
 0x25c   : > { %v1017_v19 = vadd.f32 %v1978_v17, %v925_v18  ;;  %v919_v20 = vpop.xlane.xlu0 %918 }
 0x25d   : > { %v1015_v21 = vadd.f32 %v1978_v17, %v919_v20 }
 0x25e   : > { %v1368_v22 = vmul.f32 -1.442695, %v1017_v19 }
 0x25f   : > { %v1366_v23 = vmul.f32 -1.442695, %v1015_v21  ;;  %v928_v24 = vpop.xlane.xlu1 %927 }
 0x260   : > { %1560 = vpow2.f32 %v1368_v22  ;;  %v1018_v49 = vadd.f32 %v1978_v17, %v928_v24  ;;  %v922_v25 = vpop.xlane.xlu0 %921 }
 0x261   : > { %1562 = vpow2.f32 %v1366_v23  ;;  %v1016_v26 = vadd.f32 %v1978_v17, %v922_v25 }
 0x262   : > { %v1369_v27 = vmul.f32 -1.442695, %v1018_v49 }
 0x263   : > { %v1367_v28 = vmul.f32 -1.442695, %v1016_v26 }
 0x264   : > { %1564 = vpow2.f32 %v1369_v27  ;;  %v937_v29 = vpop.xlane.xlu0 %936 }
 0x265   : > { %1566 = vpow2.f32 %v1367_v28  ;;  %v1021_v30 = vadd.f32 %v1978_v17, %v937_v29  ;;  %v940_v31 = vpop.xlane.xlu1 %939 }
 0x266   : > { %v1022_v32 = vadd.f32 %v1978_v17, %v940_v31 }
 0x267   : > { %v1372_v33 = vmul.f32 -1.442695, %v1021_v30 }
 0x268   : > { %v1373_v34 = vmul.f32 -1.442695, %v1022_v32  ;;  %v931_v35 = vpop.xlane.xlu0 %930 }
 0x269   : > { %1568 = vpow2.f32 %v1372_v33  ;;  %v1019_v36 = vadd.f32 %v1978_v17, %v931_v35  ;;  %v934_v37 = vpop.xlane.xlu1 %933 }
 0x26a   : > { %v1561_v38 = vpop.eup %1560  ;;  %1570 = vpow2.f32 %v1373_v34  ;;  %v1020_v39 = vadd.f32 %v1978_v17, %v934_v37 }
 0x26b   : > { %v1563_v40 = vpop.eup %1562  ;;  %v1145_v41 = vadd.f32 1.0, %v1561_v38  ;;  %v1370_v42 = vmul.f32 -1.442695, %v1019_v36 }
 0x26c   : > { %v1143_v43 = vadd.f32 1.0, %v1563_v40  ;;  %v1371_v45 = vmul.f32 -1.442695, %v1020_v39  ;;  %v949_v46 = vpop.xlane.xlu0 %948 }
 0x26d   : > { %1572 = vrcp.f32 %v1145_v41  ;;  %v1025_v47 = vadd.f32 %v1978_v17, %v949_v46  ;;  %v952_v48 = vpop.xlane.xlu1 %951 }
 0x26e   : > { %v1565_v58 = vpop.eup %1564  ;;  %1574 = vrcp.f32 %v1143_v43  ;;  %v1026_v50 = vadd.f32 %v1978_v17, %v952_v48 }
 0x26f   : > { %v1567_v51 = vpop.eup %1566  ;;  %v1146_v52 = vadd.f32 1.0, %v1565_v58  ;;  %1576 = vpow2.f32 %v1370_v42  ;;  %v1376_v53 = vmul.f32 -1.442695, %v1025_v47 }
 0x270   : > { %v1144_v54 = vadd.f32 1.0, %v1567_v51  ;;  %1578 = vpow2.f32 %v1371_v45  ;;  %v1377_v55 = vmul.f32 -1.442695, %v1026_v50  ;;  %v943_v56 = vpop.xlane.xlu0 %942 }
 0x271   : > { %1580 = vrcp.f32 %v1146_v52  ;;  %v1023_v57 = vadd.f32 %v1978_v17, %v943_v56  ;;  %v946_v59 = vpop.xlane.xlu1 %945 }
 0x272   : > { %1582 = vrcp.f32 %v1144_v54  ;;  %v1024_v60 = vadd.f32 %v1978_v17, %v946_v59 }
 0x273   : > { %v1569_v61 = vpop.eup %1568  ;;  %1584 = vpow2.f32 %v1376_v53  ;;  %v1374_v62 = vmul.f32 -1.442695, %v1023_v57 }
 0x274   : > { %v1571_v63 = vpop.eup %1570  ;;  %v1149_v0 = vadd.f32 1.0, %v1569_v61  ;;  %1586 = vpow2.f32 %v1377_v55  ;;  %v1375_v1 = vmul.f32 -1.442695, %v1024_v60  ;;  %v961_v2 = vpop.xlane.xlu0 %960 }
 0x275   : > { %v1150_v3 = vadd.f32 1.0, %v1571_v63  ;;  %1588 = vpow2.f32 %v1374_v62  ;;  %v1029_v4 = vadd.f32 %v1978_v17, %v961_v2  ;;  %v964_v5 = vpop.xlane.xlu1 %963 }
 0x276   : > { %1590 = vrcp.f32 %v1149_v0  ;;  %v1030_v6 = vadd.f32 %v1978_v17, %v964_v5 }
 0x277   : > { %v1573_v7 = vpop.eup %1572  ;;  %1592 = vrcp.f32 %v1150_v3  ;;  %v1380_v8 = vmul.f32 -1.442695, %v1029_v4 }
 0x278   : > { %v1575_v9 = vpop.eup %1574  ;;  %1242 = vst.msk [vmem:[%s1997_s17 + $0x10] sm:$0xff] %vm1239_vm2, %v1573_v7  ;;  %1594 = vpow2.f32 %v1375_v1  ;;  %v1381_v10 = vmul.f32 -1.442695, %v1030_v6  ;;  %v955_v11 = vpop.xlane.xlu0 %954 }
 0x279   : > { %v1577_v12 = vpop.eup %1576  ;;  %1240 = vst.msk [vmem:[%s1997_s17] sm:$0xff] %vm1239_vm2, %v1575_v9  ;;  %1596 = vpow2.f32 %v1380_v8  ;;  %v1027_v13 = vadd.f32 %v1978_v17, %v955_v11  ;;  %v958_v14 = vpop.xlane.xlu1 %957 }
 0x27a   : > { %v1579_v44 = vpop.eup %1578  ;;  %v1147_v15 = vadd.f32 1.0, %v1577_v12  ;;  %1598 = vpow2.f32 %v1381_v10  ;;  %v1028_v16 = vadd.f32 %v1978_v17, %v958_v14 }
 0x27b   : > { %v1581_v18 = vpop.eup %1580  ;;  %v1148_v19 = vadd.f32 1.0, %v1579_v44  ;;  %v1378_v20 = vmul.f32 -1.442695, %v1027_v13 }
 0x27c   : > { %v1583_v21 = vpop.eup %1582  ;;  %1243 = vst.msk [vmem:[%s1997_s17 + $0x18] sm:$0xff] %vm1239_vm2, %v1581_v18  ;;  %1600 = vrcp.f32 %v1147_v15  ;;  %v1379_v22 = vmul.f32 -1.442695, %v1028_v16  ;;  %v973_v23 = vpop.xlane.xlu0 %972 }
 0x27d   : > { %v1585_v24 = vpop.eup %1584  ;;  %1241 = vst.msk [vmem:[%s1997_s17 + $0x8] sm:$0xff] %vm1239_vm2, %v1583_v21  ;;  %1602 = vrcp.f32 %v1148_v19  ;;  %v1033_v49 = vadd.f32 %v1978_v17, %v973_v23  ;;  %v976_v25 = vpop.xlane.xlu1 %975 }
 0x27e   : > { %v1587_v26 = vpop.eup %1586  ;;  %v1153_v27 = vadd.f32 1.0, %v1585_v24  ;;  %1604 = vpow2.f32 %v1378_v20  ;;  %v1034_v28 = vadd.f32 %v1978_v17, %v976_v25 }
 0x27f   : > { %v1589_v29 = vpop.eup %1588  ;;  %v1154_v30 = vadd.f32 1.0, %v1587_v26  ;;  %1606 = vpow2.f32 %v1379_v22  ;;  %v1384_v31 = vmul.f32 -1.442695, %v1033_v49 }
 0x280   : > { %v1591_v32 = vpop.eup %1590  ;;  %1608 = vrcp.f32 %v1153_v27  ;;  %v1151_v33 = vadd.f32 1.0, %v1589_v29  ;;  %v1385_v34 = vmul.f32 -1.442695, %v1034_v28  ;;  %v967_v35 = vpop.xlane.xlu0 %966 }
 0x281   : > { %v1593_v36 = vpop.eup %1592  ;;  %1246 = vst.msk [vmem:[%s1997_s17 + $0x30] sm:$0xff] %vm1239_vm2, %v1591_v32  ;;  %1610 = vrcp.f32 %v1154_v30  ;;  %v1031_v37 = vadd.f32 %v1978_v17, %v967_v35  ;;  %v970_v38 = vpop.xlane.xlu1 %969 }
 0x282   : > { %v1595_v39 = vpop.eup %1594  ;;  %1247 = vst.msk [vmem:[%s1997_s17 + $0x38] sm:$0xff] %vm1239_vm2, %v1593_v36  ;;  %1612 = vrcp.f32 %v1151_v33  ;;  %v1032_v40 = vadd.f32 %v1978_v17, %v970_v38 }
 0x283   : > { %v1597_v41 = vpop.eup %1596  ;;  %v1152_v42 = vadd.f32 1.0, %v1595_v39  ;;  %1614 = vpow2.f32 %v1384_v31  ;;  %v1382_v46 = vmul.f32 -1.442695, %v1031_v37 }
 0x284   : > { %v1599_v43 = vpop.eup %1598  ;;  %v1157_v45 = vadd.f32 1.0, %v1597_v41  ;;  %1616 = vpow2.f32 %v1385_v34  ;;  %v985_v47 = vpop.xlane.xlu0 %984  ;;  %v1383_v58 = vmul.f32 -1.442695, %v1032_v40 }
 0x285   : > { %1618 = vrcp.f32 %v1152_v42  ;;  %v1158_v48 = vadd.f32 1.0, %v1599_v43  ;;  %v1037_v50 = vadd.f32 %v1978_v17, %v985_v47  ;;  %v988_v51 = vpop.xlane.xlu1 %987 }
 0x286   : > { %v1601_v52 = vpop.eup %1600  ;;  %1620 = vrcp.f32 %v1157_v45  ;;  %v1038_v53 = vadd.f32 %v1978_v17, %v988_v51 }
 0x287   : > { %v1603_v54 = vpop.eup %1602  ;;  %1244 = vst.msk [vmem:[%s1997_s17 + $0x20] sm:$0xff] %vm1239_vm2, %v1601_v52  ;;  %1622 = vrcp.f32 %v1158_v48  ;;  %v1388_v55 = vmul.f32 -1.442695, %v1037_v50 }
 0x288   : > { %v1605_v56 = vpop.eup %1604  ;;  %1245 = vst.msk [vmem:[%s1997_s17 + $0x28] sm:$0xff] %vm1239_vm2, %v1603_v54  ;;  %1624 = vpow2.f32 %v1382_v46  ;;  %v979_v57 = vpop.xlane.xlu0 %978  ;;  %v1389_v61 = vmul.f32 -1.442695, %v1038_v53 }
 0x289   : > { %v1607_v59 = vpop.eup %1606  ;;  %v1155_v60 = vadd.f32 1.0, %v1605_v56  ;;  %1626 = vpow2.f32 %v1383_v58  ;;  %v1035_v62 = vadd.f32 %v1978_v17, %v979_v57  ;;  %v982_v63 = vpop.xlane.xlu1 %981 }
 0x28a   : > { %v1609_v0 = vpop.eup %1608  ;;  %v1156_v1 = vadd.f32 1.0, %v1607_v59  ;;  %1628 = vpow2.f32 %v1388_v55  ;;  %v1036_v2 = vadd.f32 %v1978_v17, %v982_v63 }
 0x28b   : > { %v1611_v3 = vpop.eup %1610  ;;  %1250 = vst.msk [vmem:[%s1997_s17 + $0x50] sm:$0xff] %vm1239_vm2, %v1609_v0  ;;  %1630 = vrcp.f32 %v1155_v60  ;;  %v1386_v4 = vmul.f32 -1.442695, %v1035_v62 }
 0x28c   : > { %v1613_v5 = vpop.eup %1612  ;;  %1251 = vst.msk [vmem:[%s1997_s17 + $0x58] sm:$0xff] %vm1239_vm2, %v1611_v3  ;;  %1632 = vrcp.f32 %v1156_v1  ;;  %v1387_v6 = vmul.f32 -1.442695, %v1036_v2  ;;  %v997_v7 = vpop.xlane.xlu0 %996 }
 0x28d   : > { %v1615_v8 = vpop.eup %1614  ;;  %1248 = vst.msk [vmem:[%s1997_s17 + $0x40] sm:$0xff] %vm1239_vm2, %v1613_v5  ;;  %1634 = vpow2.f32 %v1389_v61  ;;  %v1041_v9 = vadd.f32 %v1978_v17, %v997_v7  ;;  %v1000_v10 = vpop.xlane.xlu1 %999 }
 0x28e   : > { %v1617_v11 = vpop.eup %1616  ;;  %v1161_v12 = vadd.f32 1.0, %v1615_v8  ;;  %1636 = vpow2.f32 %v1386_v4  ;;  %v1042_v13 = vadd.f32 %v1978_v17, %v1000_v10 }
 0x28f   : > { %v1619_v14 = vpop.eup %1618  ;;  %v1162_v44 = vadd.f32 1.0, %v1617_v11  ;;  %1638 = vpow2.f32 %v1387_v6  ;;  %v1392_v15 = vmul.f32 -1.442695, %v1041_v9 }
 0x290   : > { %v1621_v16 = vpop.eup %1620  ;;  %1249 = vst.msk [vmem:[%s1997_s17 + $0x48] sm:$0xff] %vm1239_vm2, %v1619_v14  ;;  %1640 = vrcp.f32 %v1161_v12  ;;  %v1393_v18 = vmul.f32 -1.442695, %v1042_v13  ;;  %v991_v19 = vpop.xlane.xlu0 %990 }
 0x291   : > { %v1623_v20 = vpop.eup %1622  ;;  %1254 = vst.msk [vmem:[%s1997_s17 + $0x70] sm:$0xff] %vm1239_vm2, %v1621_v16  ;;  %1642 = vrcp.f32 %v1162_v44  ;;  %v1039_v21 = vadd.f32 %v1978_v17, %v991_v19  ;;  %v994_v22 = vpop.xlane.xlu1 %993 }
 0x292   : > { %v1625_v23 = vpop.eup %1624  ;;  %1255 = vst.msk [vmem:[%s1997_s17 + $0x78] sm:$0xff] %vm1239_vm2, %v1623_v20  ;;  %1644 = vpow2.f32 %v1392_v15  ;;  %v1040_v24 = vadd.f32 %v1978_v17, %v994_v22 }
 0x293   : > { %v1627_v49 = vpop.eup %1626  ;;  %v1159_v25 = vadd.f32 1.0, %v1625_v23  ;;  %1646 = vpow2.f32 %v1393_v18  ;;  %v1390_v28 = vmul.f32 -1.442695, %v1039_v21 }
 0x294   : > { %v1629_v26 = vpop.eup %1628  ;;  %v1160_v27 = vadd.f32 1.0, %v1627_v49  ;;  %v1003_v29 = vpop.xlane.xlu0 %1002  ;;  %v1391_v32 = vmul.f32 -1.442695, %v1040_v24 }
 0x295   : > { %v1631_v30 = vpop.eup %1630  ;;  %1648 = vrcp.f32 %v1159_v25  ;;  %v1165_v31 = vadd.f32 1.0, %v1629_v26  ;;  %v1043_v33 = vadd.f32 %v1978_v17, %v1003_v29 }
 0x296   : > { %v1633_v34 = vpop.eup %1632  ;;  %1252 = vst.msk [vmem:[%s1997_s17 + $0x60] sm:$0xff] %vm1239_vm2, %v1631_v30  ;;  %1650 = vrcp.f32 %v1160_v27  ;;  %v1006_v35 = vpop.xlane.xlu1 %1005 }
 0x297   : > { %v1635_v36 = vpop.eup %1634  ;;  %1253 = vst.msk [vmem:[%s1997_s17 + $0x68] sm:$0xff] %vm1239_vm2, %v1633_v34  ;;  %1652 = vrcp.f32 %v1165_v31  ;;  %v1044_v37 = vadd.f32 %v1978_v17, %v1006_v35  ;;  %v1394_v43 = vmul.f32 -1.442695, %v1043_v33 }
 0x298   : > { %v1637_v38 = vpop.eup %1636  ;;  %v1166_v39 = vadd.f32 1.0, %v1635_v36  ;;  %1654 = vpow2.f32 %v1390_v28  ;;  %v1009_v40 = vpop.xlane.xlu0 %1008 }
 0x299   : > { %v1639_v41 = vpop.eup %1638  ;;  %v1163_v42 = vadd.f32 1.0, %v1637_v38  ;;  %1656 = vpow2.f32 %v1391_v32  ;;  %v1045_v45 = vadd.f32 %v1978_v17, %v1009_v40  ;;  %v1395_v48 = vmul.f32 -1.442695, %v1044_v37 }
 0x29a   : > { %v1641_v46 = vpop.eup %1640  ;;  %1658 = vrcp.f32 %v1166_v39  ;;  %v1164_v47 = vadd.f32 1.0, %v1639_v41  ;;  %v1012_v58 = vpop.xlane.xlu1 %1011 }
 0x29b   : > { %v1643_v50 = vpop.eup %1642  ;;  %1258 = vst.msk [vmem:[%s1997_s17 + $0x90] sm:$0xff] %vm1239_vm2, %v1641_v46  ;;  %1660 = vrcp.f32 %v1163_v42  ;;  %v1046_v51 = vadd.f32 %v1978_v17, %v1012_v58  ;;  %v1396_v55 = vmul.f32 -1.442695, %v1045_v45 }
 0x29c   : > { %v1645_v52 = vpop.eup %1644  ;;  %1259 = vst.msk [vmem:[%s1997_s17 + $0x98] sm:$0xff] %vm1239_vm2, %v1643_v50  ;;  %1662 = vrcp.f32 %v1164_v47 }
 0x29d   : > { %v1647_v53 = vpop.eup %1646  ;;  %v1169_v54 = vadd.f32 1.0, %v1645_v52  ;;  %1664 = vpow2.f32 %v1394_v43  ;;  %v1397_v57 = vmul.f32 -1.442695, %v1046_v51 }
 0x29e   : > { %v1170_v56 = vadd.f32 1.0, %v1647_v53  ;;  %1666 = vpow2.f32 %v1395_v48 }
 0x29f   : > { %v1649_v59 = vpop.eup %1648  ;;  %1668 = vrcp.f32 %v1169_v54 }
 0x2a0   : > { %v1651_v60 = vpop.eup %1650  ;;  %1256 = vst.msk [vmem:[%s1997_s17 + $0x80] sm:$0xff] %vm1239_vm2, %v1649_v59  ;;  %1670 = vrcp.f32 %v1170_v56 }
 0x2a1   : > { %v1653_v17 = vpop.eup %1652  ;;  %1257 = vst.msk [vmem:[%s1997_s17 + $0x88] sm:$0xff] %vm1239_vm2, %v1651_v60  ;;  %1672 = vpow2.f32 %v1396_v55 }
 0x2a2   : > { %v1655_v61 = vpop.eup %1654  ;;  %1262 = vst.msk [vmem:[%s1997_s17 + $0xb0] sm:$0xff] %vm1239_vm2, %v1653_v17  ;;  %1674 = vpow2.f32 %v1397_v57 }
 0x2a3   : > { %v1657_v62 = vpop.eup %1656  ;;  %v1167_v63 = vadd.f32 1.0, %v1655_v61 }
 0x2a4   : > { %v1659_v0 = vpop.eup %1658  ;;  %v1168_v1 = vadd.f32 1.0, %v1657_v62 }
 0x2a5   : > { %v1661_v2 = vpop.eup %1660  ;;  %1263 = vst.msk [vmem:[%s1997_s17 + $0xb8] sm:$0xff] %vm1239_vm2, %v1659_v0  ;;  %1676 = vrcp.f32 %v1167_v63 }
 0x2a6   : > { %v1663_v3 = vpop.eup %1662  ;;  %1260 = vst.msk [vmem:[%s1997_s17 + $0xa0] sm:$0xff] %vm1239_vm2, %v1661_v2  ;;  %1678 = vrcp.f32 %v1168_v1 }
 0x2a7   : > { %v1665_v4 = vpop.eup %1664  ;;  %1261 = vst.msk [vmem:[%s1997_s17 + $0xa8] sm:$0xff] %vm1239_vm2, %v1663_v3 }
 0x2a8   : > { %v1667_v5 = vpop.eup %1666  ;;  %v1171_v6 = vadd.f32 1.0, %v1665_v4 }
 0x2a9   : > { %v1669_v7 = vpop.eup %1668  ;;  %v1172_v8 = vadd.f32 1.0, %v1667_v5 }
 0x2aa   : > { %v1671_v9 = vpop.eup %1670  ;;  %1266 = vst.msk [vmem:[%s1997_s17 + $0xd0] sm:$0xff] %vm1239_vm2, %v1669_v7  ;;  %1680 = vrcp.f32 %v1171_v6 }
 0x2ab   : > { %v1673_v10 = vpop.eup %1672  ;;  %1267 = vst.msk [vmem:[%s1997_s17 + $0xd8] sm:$0xff] %vm1239_vm2, %v1671_v9  ;;  %1682 = vrcp.f32 %v1172_v8 }
 0x2ac   : > { %v1675_v11 = vpop.eup %1674  ;;  %v1173_v12 = vadd.f32 1.0, %v1673_v10 }
 0x2ad   : > { %v1174_v13 = vadd.f32 1.0, %v1675_v11 }
 0x2ae   : > { %1684 = vrcp.f32 %v1173_v12 }
 0x2af   : > { %v1677_v14 = vpop.eup %1676  ;;  %1686 = vrcp.f32 %v1174_v13 }
 0x2b0   : > { %v1679_v44 = vpop.eup %1678  ;;  %1264 = vst.msk [vmem:[%s1997_s17 + $0xc0] sm:$0xff] %vm1239_vm2, %v1677_v14 }
 0x2b1   : > { %1265 = vst.msk [vmem:[%s1997_s17 + $0xc8] sm:$0xff] %vm1239_vm2, %v1679_v44 }
 0x2b4   : > { %v1681_v15 = vpop.eup %1680 }
 0x2b5   : > { %v1683_v16 = vpop.eup %1682  ;;  %1268 = vst.msk [vmem:[%s1997_s17 + $0xe0] sm:$0xff] %vm1239_vm2, %v1681_v15 }
 0x2b6   : > { %1269 = vst.msk [vmem:[%s1997_s17 + $0xe8] sm:$0xff] %vm1239_vm2, %v1683_v16 }
 0x2b8   : > { %v1685_v18 = vpop.eup %1684 }
 0x2b9   : > { %v1687_v19 = vpop.eup %1686  ;;  %1270 = vst.msk [vmem:[%s1997_s17 + $0xf0] sm:$0xff] %vm1239_vm2, %v1685_v18 }
 0x2ba   : > { %1271 = vst.msk [vmem:[%s1997_s17 + $0xf8] sm:$0xff] %vm1239_vm2, %v1687_v19 }
 0x2bb PF: > { %s18_s26 = sadd.s32 1, %s1694_s26  }
 0x2bc   : > { %p15_p4 = scmp.ge.s32.totalorder %s18_s26, 4  }
 0x2be   :  { %17 = sbr.rel (!%p15_p4) target bundleno = 2 (0x2), region = 78 }

</bundles_post_ra>
